<compile_context>
chip_gen: v7x
topology: tpu7x:2x2x1
jax: 0.10.0
libtpu: 0.0.40
codegen_flags: <defaults>
</compile_context>

<pallas_src>
import functools

import jax
import jax.numpy as jnp
from jax.experimental import pallas as pl
from jax.experimental.pallas import tpu as pltpu

# ---------------- model dimensions (small, consistent with the module) ------
B = 2              # batch
T = 8              # sequence length (<= block_size)
C = 32             # n_embd (embedding dimension)
HS = 8             # head_size
BLOCK_SIZE = 16    # block_size (tril buffer; unused since mask=False)


def _dot_t(a, b):
    # (M, K) x (N, K) -> (M, N) == a @ b.T, f32 accumulation on the MXU.
    return jax.lax.dot_general(
        a, b, (((1,), (1,)), ((), ())), preferred_element_type=jnp.float32)


def head_kernel(x_ref, wk_ref, wq_ref, wv_ref, out_ref, attn_ref, *,
                batch, seq, scale):
    # x_ref:    (B*T, C)   activations, batch flattened into rows
    # wk/wq/wv: (HS, C)    nn.Linear weights (bias=False)
    # out_ref:  (B*T, HS)  attention output
    # attn_ref: (B*T, T)   attention maps
    x = x_ref[...]

    # Three independent projections (no lane-slicing of a fused result).
    k = _dot_t(x, wk_ref[...])            # (B*T, HS)
    q = _dot_t(x, wq_ref[...])            # (B*T, HS)
    v = _dot_t(x, wv_ref[...])            # (B*T, HS)

    outs = []
    atts = []
    for b in range(batch):                # static unroll; r0 is sublane-aligned
        r0 = b * seq
        kb = k[r0:r0 + seq, :]            # (T, HS)
        qb = q[r0:r0 + seq, :]            # (T, HS)
        vb = v[r0:r0 + seq, :]            # (T, HS)

        att = _dot_t(qb, kb) * scale      # (T, T) == q @ k.T * C**-0.5
        # numerically stable softmax (f32); divide goes to the EUP slot
        m = jnp.max(att, axis=-1, keepdims=True)
        e = jnp.exp(att - m)
        inv = pl.reciprocal(jnp.sum(e, axis=-1, keepdims=True), approx=True)
        att = e * inv

        atts.append(att)
        outs.append(jnp.dot(att, vb, preferred_element_type=jnp.float32))

    # Assemble in registers (sublane-axis concat), one full-ref store each.
    attn_ref[...] = jnp.concatenate(atts, axis=0)
    out_ref[...] = jnp.concatenate(outs, axis=0)


def head_pallas(x, wk, wq, wv):
    """x: (B, T, C); wk/wq/wv: (HS, C) (nn.Linear weights, bias=False)."""
    batch, seq, n_embd = x.shape
    head_size = wk.shape[0]
    assert wk.shape == wq.shape == wv.shape == (head_size, n_embd), \
        "weight shapes must be (head_size, n_embd)"
    scale = n_embd ** (-0.5)   # module scales by n_embd**-0.5 (not head_size)

    x2d = x.reshape(batch * seq, n_embd)      # free (row-major) reshape

    cost = pl.CostEstimate(
        flops=2 * batch * seq * n_embd * head_size * 3          # projections
              + 2 * batch * seq * seq * head_size * 2,          # q@k.T, att@v
        transcendentals=batch * seq * seq + batch * seq,        # exp + recip
        bytes_accessed=4 * (batch * seq * n_embd + 3 * head_size * n_embd
                            + batch * seq * head_size + batch * seq * seq),
    )

    vmem_spec = pl.BlockSpec(memory_space=pltpu.MemorySpace.VMEM)
    kernel = functools.partial(head_kernel, batch=batch, seq=seq, scale=scale)

    out2d, attn2d = pl.pallas_call(
        kernel,
        out_shape=(jax.ShapeDtypeStruct((batch * seq, head_size), jnp.float32),
                   jax.ShapeDtypeStruct((batch * seq, seq), jnp.float32)),
        in_specs=[vmem_spec, vmem_spec, vmem_spec, vmem_spec],
        out_specs=(vmem_spec, vmem_spec),
        cost_estimate=cost,
    )(x2d, wk, wq, wv)

    return (out2d.reshape(batch, seq, head_size),
            attn2d.reshape(batch, seq, seq))


# ---------------- pure-JAX reference (mirrors the PyTorch forward) ----------
def head_ref(x, wk, wq, wv):
    n_embd = x.shape[-1]
    k = x @ wk.T
    q = x @ wq.T
    v = x @ wv.T
    att = (q @ jnp.swapaxes(k, -1, -2)) * (n_embd ** -0.5)
    att = jax.nn.softmax(att, axis=-1)
    return att @ v, att


if __name__ == "__main__":
    key = jax.random.PRNGKey(0)
    kx, kk, kq, kv = jax.random.split(key, 4)
    x = jax.random.normal(kx, (B, T, C), jnp.float32)
    s = 0.05
    wk = jax.random.normal(kk, (HS, C), jnp.float32) * s
    wq = jax.random.normal(kq, (HS, C), jnp.float32) * s
    wv = jax.random.normal(kv, (HS, C), jnp.float32) * s

    out, attn = head_pallas(x, wk, wq, wv)
    out = jax.block_until_ready(out)
    attn = jax.block_until_ready(attn)

    out_ref, attn_ref = head_ref(x, wk, wq, wv)
    assert jnp.allclose(out, out_ref, rtol=2e-3, atol=2e-3), "output mismatch"
    assert jnp.allclose(attn, attn_ref, rtol=2e-3, atol=2e-3), "attention mismatch"

    print("KERNEL_OK")
</pallas_src>

<mosaic_0001>
module attributes {stable_mosaic.version = 11 : i64} {
  func.func @head_kernel(%arg0: memref<16x32xf32, #tpu.memory_space<vmem>>, %arg1: memref<8x32xf32, #tpu.memory_space<vmem>>, %arg2: memref<8x32xf32, #tpu.memory_space<vmem>>, %arg3: memref<8x32xf32, #tpu.memory_space<vmem>>, %arg4: memref<16x8xf32, #tpu.memory_space<vmem>>, %arg5: memref<16x8xf32, #tpu.memory_space<vmem>>) attributes {dimension_semantics = [], scalar_prefetch = 0 : i64, scratch_operands = 0 : i64, tpu.core_type = #tpu.core_type<tc>} {
    %c0 = arith.constant 0 : index
    %c0_0 = arith.constant 0 : index
    %0 = vector.load %arg0[%c0, %c0_0] : memref<16x32xf32, #tpu.memory_space<vmem>>, vector<16x32xf32>
    %c0_1 = arith.constant 0 : index
    %c0_2 = arith.constant 0 : index
    %1 = vector.load %arg1[%c0_1, %c0_2] : memref<8x32xf32, #tpu.memory_space<vmem>>, vector<8x32xf32>
    %cst = arith.constant dense<0.000000e+00> : vector<16x8xf32>
    %2 = tpu.matmul %0, %1, %cst {dimension_numbers = #tpu.dot_dimension_numbers<[1], [1], [0], [0], [0, 0, 1, 0], [], []>} : vector<16x32xf32>, vector<8x32xf32>, vector<16x8xf32> -> vector<16x8xf32>
    %c0_3 = arith.constant 0 : index
    %c0_4 = arith.constant 0 : index
    %3 = vector.load %arg2[%c0_3, %c0_4] : memref<8x32xf32, #tpu.memory_space<vmem>>, vector<8x32xf32>
    %cst_5 = arith.constant dense<0.000000e+00> : vector<16x8xf32>
    %4 = tpu.matmul %0, %3, %cst_5 {dimension_numbers = #tpu.dot_dimension_numbers<[1], [1], [0], [0], [0, 0, 1, 0], [], []>} : vector<16x32xf32>, vector<8x32xf32>, vector<16x8xf32> -> vector<16x8xf32>
    %c0_6 = arith.constant 0 : index
    %c0_7 = arith.constant 0 : index
    %5 = vector.load %arg3[%c0_6, %c0_7] : memref<8x32xf32, #tpu.memory_space<vmem>>, vector<8x32xf32>
    %cst_8 = arith.constant dense<0.000000e+00> : vector<16x8xf32>
    %6 = tpu.matmul %0, %5, %cst_8 {dimension_numbers = #tpu.dot_dimension_numbers<[1], [1], [0], [0], [0, 0, 1, 0], [], []>} : vector<16x32xf32>, vector<8x32xf32>, vector<16x8xf32> -> vector<16x8xf32>
    %7 = vector.extract_strided_slice %2 {offsets = [0, 0], sizes = [8, 8], strides = [1, 1]} : vector<16x8xf32> to vector<8x8xf32>
    %8 = vector.extract_strided_slice %4 {offsets = [0, 0], sizes = [8, 8], strides = [1, 1]} : vector<16x8xf32> to vector<8x8xf32>
    %9 = vector.extract_strided_slice %6 {offsets = [0, 0], sizes = [8, 8], strides = [1, 1]} : vector<16x8xf32> to vector<8x8xf32>
    %cst_9 = arith.constant dense<0.000000e+00> : vector<8x8xf32>
    %10 = tpu.matmul %8, %7, %cst_9 {dimension_numbers = #tpu.dot_dimension_numbers<[1], [1], [0], [0], [0, 0, 1, 0], [], []>} : vector<8x8xf32>, vector<8x8xf32>, vector<8x8xf32> -> vector<8x8xf32>
    %cst_10 = arith.constant 0.176776692 : f32
    %11 = vector.broadcast %cst_10 : f32 to vector<8x8xf32>
    %12 = arith.mulf %10, %11 : vector<8x8xf32>
    %cst_11 = arith.constant dense<0xFF800000> : vector<8xf32>
    %13 = vector.multi_reduction <maximumf>, %12, %cst_11 [1] : vector<8x8xf32> to vector<8xf32>
    %14 = vector.shape_cast %13 : vector<8xf32> to vector<8x1xf32>
    %15 = vector.broadcast %14 : vector<8x1xf32> to vector<8x8xf32>
    %16 = arith.subf %12, %15 : vector<8x8xf32>
    %17 = math.exp %16 : vector<8x8xf32>
    %cst_12 = arith.constant dense<0.000000e+00> : vector<8xf32>
    %18 = vector.multi_reduction <add>, %17, %cst_12 [1] : vector<8x8xf32> to vector<8xf32>
    %19 = vector.shape_cast %18 : vector<8xf32> to vector<8x1xf32>
    %20 = tpu.reciprocal %19 {approx = true} : vector<8x1xf32> -> vector<8x1xf32>
    %21 = vector.broadcast %20 : vector<8x1xf32> to vector<8x8xf32>
    %22 = arith.mulf %17, %21 : vector<8x8xf32>
    %cst_13 = arith.constant dense<0.000000e+00> : vector<8x8xf32>
    %23 = tpu.matmul %22, %9, %cst_13 {dimension_numbers = #tpu.dot_dimension_numbers<[1], [0], [0], [1], [0, 0, 1, 1], [], []>} : vector<8x8xf32>, vector<8x8xf32>, vector<8x8xf32> -> vector<8x8xf32>
    %24 = vector.extract_strided_slice %2 {offsets = [8, 0], sizes = [8, 8], strides = [1, 1]} : vector<16x8xf32> to vector<8x8xf32>
    %25 = vector.extract_strided_slice %4 {offsets = [8, 0], sizes = [8, 8], strides = [1, 1]} : vector<16x8xf32> to vector<8x8xf32>
    %26 = vector.extract_strided_slice %6 {offsets = [8, 0], sizes = [8, 8], strides = [1, 1]} : vector<16x8xf32> to vector<8x8xf32>
    %cst_14 = arith.constant dense<0.000000e+00> : vector<8x8xf32>
    %27 = tpu.matmul %25, %24, %cst_14 {dimension_numbers = #tpu.dot_dimension_numbers<[1], [1], [0], [0], [0, 0, 1, 0], [], []>} : vector<8x8xf32>, vector<8x8xf32>, vector<8x8xf32> -> vector<8x8xf32>
    %cst_15 = arith.constant 0.176776692 : f32
    %28 = vector.broadcast %cst_15 : f32 to vector<8x8xf32>
    %29 = arith.mulf %27, %28 : vector<8x8xf32>
    %cst_16 = arith.constant dense<0xFF800000> : vector<8xf32>
    %30 = vector.multi_reduction <maximumf>, %29, %cst_16 [1] : vector<8x8xf32> to vector<8xf32>
    %31 = vector.shape_cast %30 : vector<8xf32> to vector<8x1xf32>
    %32 = vector.broadcast %31 : vector<8x1xf32> to vector<8x8xf32>
    %33 = arith.subf %29, %32 : vector<8x8xf32>
    %34 = math.exp %33 : vector<8x8xf32>
    %cst_17 = arith.constant dense<0.000000e+00> : vector<8xf32>
    %35 = vector.multi_reduction <add>, %34, %cst_17 [1] : vector<8x8xf32> to vector<8xf32>
    %36 = vector.shape_cast %35 : vector<8xf32> to vector<8x1xf32>
    %37 = tpu.reciprocal %36 {approx = true} : vector<8x1xf32> -> vector<8x1xf32>
    %38 = vector.broadcast %37 : vector<8x1xf32> to vector<8x8xf32>
    %39 = arith.mulf %34, %38 : vector<8x8xf32>
    %cst_18 = arith.constant dense<0.000000e+00> : vector<8x8xf32>
    %40 = tpu.matmul %39, %26, %cst_18 {dimension_numbers = #tpu.dot_dimension_numbers<[1], [0], [0], [1], [0, 0, 1, 1], [], []>} : vector<8x8xf32>, vector<8x8xf32>, vector<8x8xf32> -> vector<8x8xf32>
    %41 = tpu.concatenate %22, %39 in 0 : vector<8x8xf32>, vector<8x8xf32> -> vector<16x8xf32>
    %c0_19 = arith.constant 0 : index
    %c0_20 = arith.constant 0 : index
    %42 = vector.load %arg5[%c0_19, %c0_20] : memref<16x8xf32, #tpu.memory_space<vmem>>, vector<16x8xf32>
    tpu.vector_store %arg5[%c0_19, %c0_20], %41 {strides = array<i32>} : memref<16x8xf32, #tpu.memory_space<vmem>>, vector<16x8xf32>,
    %43 = tpu.concatenate %23, %40 in 0 : vector<8x8xf32>, vector<8x8xf32> -> vector<16x8xf32>
    %c0_21 = arith.constant 0 : index
    %c0_22 = arith.constant 0 : index
    %44 = vector.load %arg4[%c0_21, %c0_22] : memref<16x8xf32, #tpu.memory_space<vmem>>, vector<16x8xf32>
    tpu.vector_store %arg4[%c0_21, %c0_22], %43 {strides = array<i32>} : memref<16x8xf32, #tpu.memory_space<vmem>>, vector<16x8xf32>,
    return
  }
}

</mosaic_0001>

<bundles_post_ra>
// kernel: tpu_custom_call.1
= control target key start
LH: loop header
LB: loop body
LE: loop exit
PB: predicated region body
PF: predicated region fallthrough
CT: control target
= control target key end

     0   :  { %11 = vsyncpa [#allocation3], 0  ;;  %s916_s0 = inlined_call_operand.hbm [shape: f32[16,32], index: 0, kind: input, shape index: {}]   ;;  %s917_s1 = inlined_call_operand.hbm [shape: f32[8,32], index: 1, kind: input, shape index: {}]   ;;  %s918_s2 = inlined_call_operand.hbm [shape: f32[8,32], index: 2, kind: input, shape index: {}]   ;;  %s919_s3 = inlined_call_operand.vmem [shape: f32[8,32], index: 3, kind: input, shape index: {}]   ;;  %s920_s4 = inlined_call_operand.vmem [shape: f32[16,8], index: 4, kind: output, shape index: {0}]   ;;  %s921_s5 = inlined_call_operand.vmem [shape: f32[16,8], index: 5, kind: output, shape index: {1}]  }
   0x1   :  { %12 = vsyncpa [#allocation5], 0  ;;  %s791_s18 = smov [#allocation4]   ;;  %s792_s20 = smov [#allocation2]  }
   0x2   :  { %s31_s19 = sshll.u32 %s791_s18, 4  ;;  %s18_s21 = sshll.u32 %s792_s20, 4  ;;  %s32_s19 = int_to_ptr.vmem [resolvable:$true] %s31_s19  ;;  %s828_s21 = int_to_ptr.vmem [resolvable:$true] %s18_s21 }
   0x3   :  { %s721_s24 = scalar_lea.hbm %s917_s1, 128 }
   0x4   :  { %p722_p0 = scmp.ne.s32.totalorder %s917_s1, %s721_s24  ;;  %p725_p1 = scmp.lt.u32.totalorder %s721_s24, %s917_s1 }
   0x6   :  { %p727_p2 = pnand %p725_p1, %p722_p0 }
   0x8   :  { %730 = shalt.err (!%p727_p2)
}
   0x9   :  { %s731_s29 = scalar_lea.vmem %s32_s19, 128  ;;  %p736_p4 = scmp.lt.s32.totalorder %s32_s19, %s32_s19 }
   0xa   :  { %p732_p3 = scmp.ne.s32.totalorder %s32_s19, %s731_s29  ;;  %p737_p5 = scmp.lt.s32.totalorder %s731_s29, %s731_s29 }
   0xc   :  { %p738_p6 = por %p737_p5, %p736_p4 }
   0xe   :  { %p739_p7 = pnand %p738_p6, %p732_p3 }
  0x10   :  { %742 = shalt.err (!%p739_p7)
}
  0x11   :  { %34 = dma.hbm_to_vmem [thread:$0]  %s917_s1, 128, %s32_s19, [#allocation5]  }
  0x12   :  { %s743_s9 = scalar_lea.hbm %s916_s0, 256 }
  0x13   :  { %p744_p8 = scmp.ne.s32.totalorder %s916_s0, %s743_s9  ;;  %p747_p9 = scmp.lt.u32.totalorder %s743_s9, %s916_s0 }
  0x15   :  { %p749_p10 = pnand %p747_p9, %p744_p8 }
  0x17   :  { %752 = shalt.err (!%p749_p10)
}
  0x18   :  { %s753_s14 = scalar_lea.vmem %s828_s21, 256  ;;  %p758_p12 = scmp.lt.s32.totalorder %s828_s21, %s828_s21 }
  0x19   :  { %p754_p11 = scmp.ne.s32.totalorder %s828_s21, %s753_s14  ;;  %p759_p13 = scmp.lt.s32.totalorder %s753_s14, %s753_s14 }
  0x1b   :  { %p760_p0 = por %p759_p13, %p758_p12 }
  0x1d   :  { %p761_p1 = pnand %p760_p0, %p754_p11 }
  0x1f   :  { %764 = shalt.err (!%p761_p1)
}
  0x20   :  { %s793_s1 = smov 128   ;;  %s794_s15 = smov 8  }
  0x21   :  { %24 = dma.hbm_to_vmem [thread:$0]  %s916_s0, 256, %s828_s21, [#allocation3], %s793_s1, %s793_s1, %s794_s15  }
  0x22   :  { %s795_s18 = smov [#allocation6]   ;;  %s765_s23 = scalar_lea.hbm %s918_s2, 128 }
  0x23   :  { %s41_s19 = sshll.u32 %s795_s18, 4  ;;  %p766_p2 = scmp.ne.s32.totalorder %s918_s2, %s765_s23  ;;  %s42_s19 = int_to_ptr.vmem [resolvable:$true] %s41_s19 }
  0x24   :  { %p769_p3 = scmp.lt.u32.totalorder %s765_s23, %s918_s2 }
  0x26   :  { %p771_p4 = pnand %p769_p3, %p766_p2 }
  0x28   :  { %774 = shalt.err (!%p771_p4)
}
  0x29   :  { %s775_s28 = scalar_lea.vmem %s42_s19, 128  ;;  %p780_p6 = scmp.lt.s32.totalorder %s42_s19, %s42_s19 }
  0x2a   :  { %p776_p5 = scmp.ne.s32.totalorder %s42_s19, %s775_s28  ;;  %p781_p7 = scmp.lt.s32.totalorder %s775_s28, %s775_s28 }
  0x2c   :  { %p782_p8 = por %p781_p7, %p780_p6 }
  0x2e   :  { %p783_p9 = pnand %p782_p8, %p776_p5 }
  0x30   :  { %786 = shalt.err (!%p783_p9)
}
  0x31   :  { %44 = dma.hbm_to_vmem [thread:$0]  %s918_s2, 128, %s42_s19, [#allocation5]  }
  0x32   :  { %787 = dma.done.wait [#allocation3], 256  }
  0x33   :  { %788 = vsyncadd [#allocation3], 4294967040 }
  0x34   :  { %789 = dma.done.wait [#allocation5], 256  }
  0x35   :  { %790 = vsyncadd [#allocation5], 4294967040  ;;  %vm59_vm0 = vcmask 261120   ;;  %v58_v0 = vld [vmem:[#allocation4] sm:$0xff]  ;;  %v56_v1 = vld [vmem:[#allocation2] sm:$0xff]  ;;  %v796_v4 = vmov 0.0  }
  0x36   :  { %v144_v2 = vld [vmem:[#allocation6] sm:$0xff]  ;;  %671 = vmatprep.subr.msk.mxu0 %vm59_vm0, %v58_v0  ;;  %673 = vmatprep.mubr.msk.f32.mxu0 %vm59_vm0, %v56_v1  ;;  %v57_v3 = vld [vmem:[#allocation2 + $0x8] sm:$0xff]  ;;  %vm797_vm1 = vmmov 0   ;;  %vm302_vm2 = vcmask 64512   ;;  %v223_v9 = vld [vmem:[%s919_s3] sm:$0xff] }
  0x37   :  { %672 = vmatpush3.xpose.msk.msra.mxu0 %vm59_vm0, %v58_v0  ;;  %676 = vmatprep.subr.msk.mxu1 %vm59_vm0, %v144_v2 }
  0x38   :  { %677 = vmatpush3.xpose.msk.msra.mxu1 %vm59_vm0, %v144_v2  ;;  %678 = vmatprep.mubr.msk.f32.mxu1 %vm59_vm0, %v56_v1 }
  0x39   :  { %686 = vmatprep.subr.mxu1 %v796_v4  ;;  %681 = vmatprep.subr.msk.mxu0 %vm59_vm0, %v223_v9 }
  0x3a   :  { %674 = vmatmul.mubr.msk.f32.vlgmr.msra.gmra.mrb[0].mxu0 %vm59_vm0, %v57_v3 }
  0x3b   :  { %679 = vmatmul.mubr.msk.f32.vlgmr.msra.gmra.mrb[0].mxu1 %vm59_vm0, %v57_v3  ;;  %683 = vmatprep.mubr.msk.f32.mxu0 %vm59_vm0, %v56_v1 }
  0x3c   :  { %688 = vmatprep.mubr.msk.f32.mxu1 %vm797_vm1, %v796_v4  ;;  %682 = vmatpush3.xpose.msk.msra.mxu0 %vm59_vm0, %v223_v9 }
  0x3d   :  { %691 = vmatprep.subr.mxu0 %v796_v4 }
  0x3f   :  { %684 = vmatmul.mubr.msk.f32.vlgmr.msra.gmra.mrb[2].mxu0 %vm59_vm0, %v57_v3 }
  0x40   :  { %693 = vmatprep.mubr.msk.f32.mxu0 %vm797_vm1, %v796_v4 }
 0x10d   :  { %v675_v5 = vpop.f32.mrb[0].mxu0 }
 0x10e   :  { %v135_v6 = vpop.f32.mrb[1].mxu0  ;;  %v680_v7 = vpop.f32.mrb[0].mxu1 }
 0x10f   :  { %687 = vmatpush3.xpose.msk.msra.mxu1 %vm302_vm2, %v135_v6  ;;  %v214_v8 = vpop.f32.mrb[1].mxu1 }
 0x110   :  { %696 = vmatprep.subr.mxu1 %v796_v4 }
 0x112   :  { %689 = vmatmul.mubr.msk.f32.vlgmr.msra.gmra.mrb[2].mxu1 %vm302_vm2, %v214_v8  ;;  %v685_v28 = vpop.f32.mrb[2].mxu0 }
 0x113   :  { %697 = vmatpush3.xpose.msk.msra.mxu1 %vm302_vm2, %v675_v5  ;;  %698 = vmatprep.mubr.msk.f32.mxu1 %vm797_vm1, %v796_v4  ;;  %v293_v29 = vpop.f32.mrb[3].mxu0 }
 0x114   :  { %692 = vmatpush3.msra.mxu0 %v293_v29 }
 0x115   :  { %701 = vmatprep.subr.mxu0 %v796_v4 }
 0x116   :  { %699 = vmatmul.mubr.msk.f32.vlgmr.msra.gmra.mrb[4].mxu1 %vm302_vm2, %v680_v7 }
 0x1e5   :  { %v375_v10 = vpop.f32.mrb[2].mxu1 }
 0x1e6   :  { %v379_v11 = vmul.f32 0.17677669, %v375_v10  ;;  %v690_v12 = vpop.f32.mrb[3].mxu1 }
 0x1e8   :  { %v380_v13 = vsel %vm302_vm2, %v379_v11, -inf }
 0x1e9   :  { %381 = vmax.xlane.f32.xlu0 %v380_v13  ;;  %v536_v14 = vpop.f32.mrb[4].mxu1 }
 0x1ea   :  { %v540_v15 = vmul.f32 0.17677669, %v536_v14  ;;  %v700_v16 = vpop.f32.mrb[5].mxu1 }
 0x1ec   :  { %v541_v17 = vsel %vm302_vm2, %v540_v15, -inf }
 0x1ed   :  { %542 = vmax.xlane.f32.xlu0 %v541_v17 }
 0x276   :  { %v382_v18 = vpop.xlane.xlu0 %381 }
 0x277   :  { %v383_v19 = vsub.f32 %v379_v11, %v382_v18 }
 0x279   :  { %v384_v20 = vmul.f32 1.442695, %v383_v19 }
 0x27a   :  { %v543_v21 = vpop.xlane.xlu0 %542 }
 0x27b   :  { %713 = vpow2.f32 %v384_v20  ;;  %v544_v22 = vsub.f32 %v540_v15, %v543_v21 }
 0x27d   :  { %v545_v23 = vmul.f32 1.442695, %v544_v22 }
 0x27f   :  { %715 = vpow2.f32 %v545_v23 }
 0x285   :  { %v714_v24 = vpop.eup %713 }
 0x286   :  { %v386_v25 = vsel %vm302_vm2, %v714_v24, 0.0 }
 0x287   :  { %387 = vadd.xlane.f32.xlu1 %v386_v25 }
 0x289   :  { %v716_v26 = vpop.eup %715 }
 0x28a   :  { %v547_v27 = vsel %vm302_vm2, %v716_v26, 0.0 }
 0x28b   :  { %548 = vadd.xlane.f32.xlu1 %v547_v27 }
 0x314   :  { %v388_v30 = vpop.xlane.xlu1 %387 }
 0x315   :  { %717 = vrcp.f32 %v388_v30 }
 0x318   :  { %v549_v31 = vpop.xlane.xlu1 %548 }
 0x319   :  { %719 = vrcp.f32 %v549_v31 }
 0x31f   :  { %v718_v32 = vpop.eup %717 }
 0x320   :  { %v390_v33 = vmul.f32 %v718_v32, %v714_v24 }
 0x322   :  { %625 = vst.msk [vmem:[%s921_s5] sm:$0xff] %vm302_vm2, %v390_v33  ;;  %694 = vmatmul.mubr.msk.f32.vlgmr.msra.gmra.mrb[4].mxu0 %vm302_vm2, %v390_v33 }
 0x323   :  { %v720_v34 = vpop.eup %719  ;;  %702 = vmatpush3.msra.mxu0 %v685_v28  ;;  %703 = vmatprep.mubr.msk.f32.mxu0 %vm797_vm1, %v796_v4 }
 0x324   :  { %v551_v35 = vmul.f32 %v720_v34, %v716_v26 }
 0x326   :  { %626 = vst.msk [vmem:[%s921_s5 + $0x8] sm:$0xff] %vm302_vm2, %v551_v35  ;;  %704 = vmatmul.mubr.msk.f32.vlgmr.msra.gmra.mrb[6].mxu0 %vm302_vm2, %v551_v35 }
 0x3f5   :  { %v460_v36 = vpop.f32.mrb[4].mxu0 }
 0x3f6   :  { %627 = vst.msk [vmem:[%s920_s4] sm:$0xff] %vm302_vm2, %v460_v36  ;;  %v695_v37 = vpop.f32.mrb[5].mxu0 }
 0x3f9   :  { %v621_v38 = vpop.f32.mrb[6].mxu0 }
 0x3fa   :  { %628 = vst.msk [vmem:[%s920_s4 + $0x8] sm:$0xff] %vm302_vm2, %v621_v38  ;;  %v705_v39 = vpop.f32.mrb[7].mxu0 }
 0x3fb   :  { %637 = vsyncpa [#allocation3], 1 }
 0x3fc   :  { %638 = vsyncpa [#allocation5], 1 }

</bundles_post_ra>
